<compile_context>
chip_gen: v7x
topology: tpu7x:2x2x1
jax: 0.10.0
libtpu: 0.0.40
codegen_flags: <defaults>
</compile_context>

<pallas_src>
import jax
import jax.numpy as jnp
from jax import lax
from jax.experimental import pallas as pl
from jax.experimental.pallas import tpu as pltpu

EPS = 1e-8  # magnitude() stabilizing epsilon (harmonic library convention)


# ---------------------------------------------------------------------------
# helpers
# ---------------------------------------------------------------------------
def _rup(x, m):
    return ((x + m - 1) // m) * m


def _vmem_budgets():
    """Generation-aware (block_budget, vmem_limit_bytes)."""
    cap = 64 << 20  # conservative default = v7x per-TC VMEM
    try:
        info = pltpu.get_tpu_info()
        cap = int(getattr(info, "vmem_capacity_bytes", cap)) or cap
    except Exception:
        pass
    block_budget = cap * 3 // 8   # ≈48 MiB on v5e/v6e (128 MiB), ≈24 MiB on v7x
    vmem_limit = cap * 3 // 4     # ≈96 MiB / ≈48 MiB scoped-VMEM limit
    return block_budget, vmem_limit


def _per_pixel_bytes(F, fused):
    """VMEM bytes per pixel column (sublane padding + double buffering included)."""
    Fp = _rup(F, 8)          # f32 sublane padding of the F-row slabs
    F2p = _rup(2 * F, 8)
    io = 2 * (2 * 2 * Fp)    # in + out blocks, double-buffered, real+imag rows
    inter = (2 * Fp + F2p) if fused else (Fp + F2p)   # mag / g intermediates
    return (io + inter) * 4


def _choose_pixel_tile(P, F, block_budget, min_pixel_blocks):
    """Largest lane-aligned pixel tile under the budget (no divisibility required)."""
    per_px = _per_pixel_bytes(F, fused=False)
    cap_px = max(128, block_budget // per_px)
    if min_pixel_blocks <= 1 and P <= cap_px:
        return P  # whole slab: one contiguous DMA per real/imag slab (longest rows)
    target = _rup(pl.cdiv(P, max(min_pixel_blocks, 1)), 128)
    cap_aligned = max((cap_px // 128) * 128, 128)
    tp = max(min(target, cap_aligned), 128)
    return min(tp, _rup(P, 128))


# ---------------------------------------------------------------------------
# kernels
# ---------------------------------------------------------------------------
def _gate_fused_kernel(x_ref, wm_ref, bb_ref, w1_ref, w2_ref, b2_ref, o_ref):
    """Whole per-batch slab resident in VMEM; mean branch computed in-kernel."""
    xr = x_ref[0, 0]                                   # [F, P]
    xi = x_ref[1, 0]                                   # [F, P]

    mag = jnp.sqrt(xr * xr + xi * xi + EPS)            # [F, P]

    # spatial-mean branch (fused: no extra HBM pass over x)
    mr = jnp.mean(xr, axis=-1, keepdims=True)          # [F, 1]
    mi = jnp.mean(xi, axis=-1, keepdims=True)          # [F, 1]
    mmag = jnp.sqrt(mr * mr + mi * mi + EPS)           # [F, 1]
    # bb = mean_b + conv1_b (folded in the wrapper)
    g_m = jnp.dot(wm_ref[...], mmag,
                  preferred_element_type=jnp.float32,
                  precision=lax.Precision.HIGHEST) + bb_ref[...]   # [2F, 1]

    # conv1 (1x1 conv == per-pixel matmul), weight on the left: F -> 2F
    g = jnp.dot(w1_ref[...], mag,
                preferred_element_type=jnp.float32,
                precision=lax.Precision.HIGHEST) + g_m             # [2F, P]
    g = jnp.maximum(g, 0.0)

    # conv2: 2F -> F, sigmoid
    g = jnp.dot(w2_ref[...], g,
                preferred_element_type=jnp.float32,
                precision=lax.Precision.HIGHEST) + b2_ref[...]     # [F, P]
    # exact sigmoid; pl.reciprocal(approx=True) would exceed the 1e-5 tolerance
    g = 1.0 / (1.0 + jnp.exp(-g))

    o_ref[0, 0] = xr * g
    o_ref[1, 0] = xi * g


def _gate_tiled_kernel(x_ref, gm_ref, w1_ref, w2_ref, b2_ref, o_ref):
    """Pixel-tiled fallback; mean branch hoisted to XLA (gm already has b1 folded)."""
    xr = x_ref[0, 0]                                   # [F, TP]
    xi = x_ref[1, 0]                                   # [F, TP]

    mag = jnp.sqrt(xr * xr + xi * xi + EPS)            # [F, TP]

    g = jnp.dot(w1_ref[...], mag,
                preferred_element_type=jnp.float32,
                precision=lax.Precision.HIGHEST) + gm_ref[0]       # [2F, TP]
    g = jnp.maximum(g, 0.0)
    g = jnp.dot(w2_ref[...], g,
                preferred_element_type=jnp.float32,
                precision=lax.Precision.HIGHEST) + b2_ref[...]     # [F, TP]
    g = 1.0 / (1.0 + jnp.exp(-g))

    o_ref[0, 0] = xr * g
    o_ref[1, 0] = xi * g


# ---------------------------------------------------------------------------
# wrapper
# ---------------------------------------------------------------------------
def global_gate_2d(x, params):
    """x: [2, b, F, H, W] float32. Returns same shape."""
    two, b, F, H, W = x.shape
    assert two == 2
    P = H * W

    # free reshape: pixels (H*W) land on the lane axis, channels on sublanes
    xp = x.reshape(2, b, F, P)

    # weights laid out for weight-on-the-left matmuls
    w1 = params["conv1_w"].reshape(2 * F, F)                   # [2F, F]
    b1 = params["conv1_b"].reshape(2 * F, 1)                   # [2F, 1]
    w2 = params["conv2_w"].reshape(F, 2 * F)                   # [F, 2F]
    b2 = params["conv2_b"].reshape(F, 1)                       # [F, 1]
    wm = params["mean_w"]                                      # [2F, F]
    bm = params["mean_b"].reshape(2 * F, 1)                    # [2F, 1]

    block_budget, vmem_limit = _vmem_budgets()

    def cparams(sem):
        return pltpu.CompilerParams(dimension_semantics=sem,
                                    vmem_limit_bytes=vmem_limit)

    # -------- fused fast path: per-batch slab resident in VMEM ----------------
    fused_bytes = _per_pixel_bytes(F, fused=True) * _rup(P, 128)
    if fused_bytes <= block_budget and b >= 2:
        bb = bm + b1                                 # fold conv1 bias into mean bias
        x_spec = pl.BlockSpec((2, 1, F, P), lambda i: (0, i, 0, 0))
        full = lambda a: pl.BlockSpec(a.shape, lambda i: (0,) * a.ndim)
        out = pl.pallas_call(
            _gate_fused_kernel,
            out_shape=jax.ShapeDtypeStruct((2, b, F, P), x.dtype),
            grid=(b,),
            in_specs=[x_spec, full(wm), full(bb), full(w1), full(w2), full(b2)],
            out_specs=x_spec,
            compiler_params=cparams(("parallel",)),
        )(xp, wm, bb, w1, w2, b2)
        return out.reshape(2, b, F, H, W)

    # -------- tiled fallback: mean branch hoisted to XLA, pixel axis tiled ----
    means = xp.mean(axis=-1)                                   # [2, b, F]
    mean_mag = jnp.sqrt(means[0] ** 2 + means[1] ** 2 + EPS)   # [b, F]
    g_m = mean_mag @ wm.T + params["mean_b"]                   # [b, 2F]
    gm = g_m[:, :, None] + b1[None]                            # conv1 bias folded

    min_pixel_blocks = 2 if b < 2 else 1      # keep v7x's 2nd TensorCore busy
    TP = _choose_pixel_tile(P, F, block_budget, min_pixel_blocks)
    grid = (b, pl.cdiv(P, TP))                # ragged last block handled by Pallas

    x_spec = pl.BlockSpec((2, 1, F, TP), lambda i, j: (0, i, 0, j))
    gm_spec = pl.BlockSpec((1, 2 * F, 1), lambda i, j: (i, 0, 0))
    full = lambda a: pl.BlockSpec(a.shape, lambda i, j: (0,) * a.ndim)

    # TODO(synk): if profiling shows exposed DMA on small tiles, bump x_spec to
    # pipeline_mode=pl.Buffered(3).
    out = pl.pallas_call(
        _gate_tiled_kernel,
        out_shape=jax.ShapeDtypeStruct((2, b, F, P), x.dtype),
        grid=grid,
        in_specs=[x_spec, gm_spec, full(w1), full(w2), full(b2)],
        out_specs=x_spec,
        compiler_params=cparams(("parallel", "parallel")),
    )(xp, gm, w1, w2, b2)
    return out.reshape(2, b, F, H, W)


# ---------------------------------------------------------------------------
# reference + test
# ---------------------------------------------------------------------------
def _reference(x, params):
    """Pure-JAX reference mirroring the PyTorch forward."""
    F = x.shape[2]
    mag = jnp.sqrt(x[0] ** 2 + x[1] ** 2 + EPS)                        # [b,F,H,W]
    w1 = params["conv1_w"].reshape(2 * F, F)
    g_x = jnp.einsum('of,bfhw->bohw', w1, mag) \
        + params["conv1_b"][None, :, None, None]
    means = x.reshape(*x.shape[:3], -1).mean(axis=3)                   # [2,b,F]
    mean_mag = jnp.sqrt(means[0] ** 2 + means[1] ** 2 + EPS)           # [b,F]
    g_m = mean_mag @ params["mean_w"].T + params["mean_b"]             # [b,2F]
    g = jax.nn.relu(g_x + g_m[:, :, None, None])
    w2 = params["conv2_w"].reshape(F, 2 * F)
    g = jnp.einsum('of,bfhw->bohw', w2, g) \
        + params["conv2_b"][None, :, None, None]
    g = jax.nn.sigmoid(g)
    return x * g[None]


def _init_params(key, F):
    ks = jax.random.split(key, 6)
    s = 0.2
    return {
        "mean_w":  s * jax.random.normal(ks[0], (2 * F, F), jnp.float32),
        "mean_b":  s * jax.random.normal(ks[1], (2 * F,), jnp.float32),
        "conv1_w": s * jax.random.normal(ks[2], (2 * F, F, 1, 1), jnp.float32),
        "conv1_b": s * jax.random.normal(ks[3], (2 * F,), jnp.float32),
        "conv2_w": s * jax.random.normal(ks[4], (F, 2 * F, 1, 1), jnp.float32),
        "conv2_b": s * jax.random.normal(ks[5], (F,), jnp.float32),
    }


if __name__ == "__main__":
    key = jax.random.PRNGKey(0)
    k_x, k_p = jax.random.split(key)

    repr_ = (2, 2)                      # total_fmaps F = 4
    F = sum(repr_)
    b, H, W = 2, 16, 16
    x = jax.random.normal(k_x, (2, b, F, H, W), jnp.float32)
    params = _init_params(k_p, F)

    out = jax.block_until_ready(global_gate_2d(x, params))
    ref = jax.block_until_ready(_reference(x, params))

    assert out.shape == x.shape and out.dtype == x.dtype
    assert jnp.allclose(out, ref, atol=1e-5, rtol=1e-5), \
        f"max abs err {jnp.max(jnp.abs(out - ref))}"
    print("KERNEL_OK")
</pallas_src>

<mosaic_0001>
module attributes {stable_mosaic.version = 11 : i64} {
  func.func @_gate_fused_kernel(%arg0: i32, %arg1: memref<2x1x4x256xf32, #tpu.memory_space<vmem>>, %arg2: memref<8x4xf32, #tpu.memory_space<vmem>>, %arg3: memref<8x1xf32, #tpu.memory_space<vmem>>, %arg4: memref<8x4xf32, #tpu.memory_space<vmem>>, %arg5: memref<4x8xf32, #tpu.memory_space<vmem>>, %arg6: memref<4x1xf32, #tpu.memory_space<vmem>>, %arg7: memref<2x1x4x256xf32, #tpu.memory_space<vmem>>) attributes {dimension_semantics = [#tpu.dimension_semantics<parallel>], iteration_bounds = array<i64: 2>, scalar_prefetch = 0 : i64, scratch_operands = 0 : i64, tpu.core_type = #tpu.core_type<tc>, window_params = [{transform_indices = @transform_0, window_bounds = array<i64: 2, 1, 4, 256>}, {pipeline_mode = #tpu.pipeline_mode<synchronous>, transform_indices = @transform_1, window_bounds = array<i64: 8, 4>}, {pipeline_mode = #tpu.pipeline_mode<synchronous>, transform_indices = @transform_2, window_bounds = array<i64: 8, 1>}, {pipeline_mode = #tpu.pipeline_mode<synchronous>, transform_indices = @transform_3, window_bounds = array<i64: 8, 4>}, {pipeline_mode = #tpu.pipeline_mode<synchronous>, transform_indices = @transform_4, window_bounds = array<i64: 4, 8>}, {pipeline_mode = #tpu.pipeline_mode<synchronous>, transform_indices = @transform_5, window_bounds = array<i64: 4, 1>}, {transform_indices = @transform_6, window_bounds = array<i64: 2, 1, 4, 256>}]} {
    %c0 = arith.constant 0 : index
    %c0_0 = arith.constant 0 : index
    %c0_1 = arith.constant 0 : index
    %c0_2 = arith.constant 0 : index
    %0 = vector.load %arg1[%c0, %c0_0, %c0_1, %c0_2] : memref<2x1x4x256xf32, #tpu.memory_space<vmem>>, vector<1x1x4x256xf32>
    %1 = vector.shape_cast %0 : vector<1x1x4x256xf32> to vector<4x256xf32>
    %c1 = arith.constant 1 : index
    %c0_3 = arith.constant 0 : index
    %c0_4 = arith.constant 0 : index
    %c0_5 = arith.constant 0 : index
    %2 = vector.load %arg1[%c1, %c0_3, %c0_4, %c0_5] : memref<2x1x4x256xf32, #tpu.memory_space<vmem>>, vector<1x1x4x256xf32>
    %3 = vector.shape_cast %2 : vector<1x1x4x256xf32> to vector<4x256xf32>
    %4 = arith.mulf %1, %1 : vector<4x256xf32>
    %5 = arith.mulf %3, %3 : vector<4x256xf32>
    %6 = arith.addf %4, %5 : vector<4x256xf32>
    %cst = arith.constant 9.99999993E-9 : f32
    %7 = vector.broadcast %cst : f32 to vector<4x256xf32>
    %8 = arith.addf %6, %7 : vector<4x256xf32>
    %9 = math.sqrt %8 : vector<4x256xf32>
    %cst_6 = arith.constant dense<0.000000e+00> : vector<4xf32>
    %10 = vector.multi_reduction <add>, %1, %cst_6 [1] : vector<4x256xf32> to vector<4xf32>
    %11 = vector.shape_cast %10 : vector<4xf32> to vector<4x1xf32>
    %cst_7 = arith.constant 2.560000e+02 : f32
    %12 = vector.broadcast %cst_7 : f32 to vector<4x1xf32>
    %13 = arith.divf %11, %12 : vector<4x1xf32>
    %cst_8 = arith.constant dense<0.000000e+00> : vector<4xf32>
    %14 = vector.multi_reduction <add>, %3, %cst_8 [1] : vector<4x256xf32> to vector<4xf32>
    %15 = vector.shape_cast %14 : vector<4xf32> to vector<4x1xf32>
    %cst_9 = arith.constant 2.560000e+02 : f32
    %16 = vector.broadcast %cst_9 : f32 to vector<4x1xf32>
    %17 = arith.divf %15, %16 : vector<4x1xf32>
    %18 = arith.mulf %13, %13 : vector<4x1xf32>
    %19 = arith.mulf %17, %17 : vector<4x1xf32>
    %20 = arith.addf %18, %19 : vector<4x1xf32>
    %cst_10 = arith.constant 9.99999993E-9 : f32
    %21 = vector.broadcast %cst_10 : f32 to vector<4x1xf32>
    %22 = arith.addf %20, %21 : vector<4x1xf32>
    %23 = math.sqrt %22 : vector<4x1xf32>
    %c0_11 = arith.constant 0 : index
    %c0_12 = arith.constant 0 : index
    %24 = vector.load %arg2[%c0_11, %c0_12] : memref<8x4xf32, #tpu.memory_space<vmem>>, vector<8x4xf32>
    %cst_13 = arith.constant dense<0.000000e+00> : vector<8x1xf32>
    %25 = tpu.matmul %24, %23, %cst_13 {dimension_numbers = #tpu.dot_dimension_numbers<[1], [0], [0], [1], [0, 0, 1, 1], [], []>, precision = #tpu.contract_precision<fp32>} : vector<8x4xf32>, vector<4x1xf32>, vector<8x1xf32> -> vector<8x1xf32>
    %c0_14 = arith.constant 0 : index
    %c0_15 = arith.constant 0 : index
    %26 = vector.load %arg3[%c0_14, %c0_15] : memref<8x1xf32, #tpu.memory_space<vmem>>, vector<8x1xf32>
    %27 = arith.addf %25, %26 : vector<8x1xf32>
    %c0_16 = arith.constant 0 : index
    %c0_17 = arith.constant 0 : index
    %28 = vector.load %arg4[%c0_16, %c0_17] : memref<8x4xf32, #tpu.memory_space<vmem>>, vector<8x4xf32>
    %cst_18 = arith.constant dense<0.000000e+00> : vector<8x256xf32>
    %29 = tpu.matmul %28, %9, %cst_18 {dimension_numbers = #tpu.dot_dimension_numbers<[1], [0], [0], [1], [0, 0, 1, 1], [], []>, precision = #tpu.contract_precision<fp32>} : vector<8x4xf32>, vector<4x256xf32>, vector<8x256xf32> -> vector<8x256xf32>
    %30 = vector.broadcast %27 : vector<8x1xf32> to vector<8x256xf32>
    %31 = arith.addf %29, %30 : vector<8x256xf32>
    %cst_19 = arith.constant 0.000000e+00 : f32
    %32 = vector.broadcast %cst_19 : f32 to vector<8x256xf32>
    %33 = arith.maximumf %31, %32 : vector<8x256xf32>
    %c0_20 = arith.constant 0 : index
    %c0_21 = arith.constant 0 : index
    %34 = vector.load %arg5[%c0_20, %c0_21] : memref<4x8xf32, #tpu.memory_space<vmem>>, vector<4x8xf32>
    %cst_22 = arith.constant dense<0.000000e+00> : vector<4x256xf32>
    %35 = tpu.matmul %34, %33, %cst_22 {dimension_numbers = #tpu.dot_dimension_numbers<[1], [0], [0], [1], [0, 0, 1, 1], [], []>, precision = #tpu.contract_precision<fp32>} : vector<4x8xf32>, vector<8x256xf32>, vector<4x256xf32> -> vector<4x256xf32>
    %c0_23 = arith.constant 0 : index
    %c0_24 = arith.constant 0 : index
    %36 = vector.load %arg6[%c0_23, %c0_24] : memref<4x1xf32, #tpu.memory_space<vmem>>, vector<4x1xf32>
    %37 = vector.broadcast %36 : vector<4x1xf32> to vector<4x256xf32>
    %38 = arith.addf %35, %37 : vector<4x256xf32>
    %cst_25 = arith.constant 0.000000e+00 : f32
    %39 = vector.broadcast %cst_25 : f32 to vector<4x256xf32>
    %40 = arith.subf %39, %38 : vector<4x256xf32>
    %41 = math.exp %40 : vector<4x256xf32>
    %cst_26 = arith.constant 1.000000e+00 : f32
    %42 = vector.broadcast %cst_26 : f32 to vector<4x256xf32>
    %43 = arith.addf %42, %41 : vector<4x256xf32>
    %cst_27 = arith.constant 1.000000e+00 : f32
    %44 = vector.broadcast %cst_27 : f32 to vector<4x256xf32>
    %45 = arith.divf %44, %43 : vector<4x256xf32>
    %46 = arith.mulf %1, %45 : vector<4x256xf32>
    %c0_28 = arith.constant 0 : index
    %c0_29 = arith.constant 0 : index
    %c0_30 = arith.constant 0 : index
    %c0_31 = arith.constant 0 : index
    %47 = vector.load %arg7[%c0_28, %c0_29, %c0_30, %c0_31] : memref<2x1x4x256xf32, #tpu.memory_space<vmem>>, vector<1x1x4x256xf32>
    %48 = vector.shape_cast %47 : vector<1x1x4x256xf32> to vector<4x256xf32>
    %49 = vector.shape_cast %46 : vector<4x256xf32> to vector<1x1x4x256xf32>
    tpu.vector_store %arg7[%c0_28, %c0_29, %c0_30, %c0_31], %49 {strides = array<i32>} : memref<2x1x4x256xf32, #tpu.memory_space<vmem>>, vector<1x1x4x256xf32>,
    %50 = arith.mulf %3, %45 : vector<4x256xf32>
    %c1_32 = arith.constant 1 : index
    %c0_33 = arith.constant 0 : index
    %c0_34 = arith.constant 0 : index
    %c0_35 = arith.constant 0 : index
    %51 = vector.load %arg7[%c1_32, %c0_33, %c0_34, %c0_35] : memref<2x1x4x256xf32, #tpu.memory_space<vmem>>, vector<1x1x4x256xf32>
    %52 = vector.shape_cast %51 : vector<1x1x4x256xf32> to vector<4x256xf32>
    %53 = vector.shape_cast %50 : vector<4x256xf32> to vector<1x1x4x256xf32>
    tpu.vector_store %arg7[%c1_32, %c0_33, %c0_34, %c0_35], %53 {strides = array<i32>} : memref<2x1x4x256xf32, #tpu.memory_space<vmem>>, vector<1x1x4x256xf32>,
    return
  }
  func.func @transform_0(%arg0: i32) -> (i32, i32, i32, i32) {
    %c0_i32 = arith.constant 0 : i32
    %c0_i32_0 = arith.constant 0 : i32
    %c0_i32_1 = arith.constant 0 : i32
    %c0_i32_2 = arith.constant 0 : i32
    return %c0_i32, %arg0, %c0_i32_0, %c0_i32_1 : i32, i32, i32, i32
  }
  func.func @transform_1(%arg0: i32) -> (i32, i32) {
    %c0_i32 = arith.constant 0 : i32
    %c0_i32_0 = arith.constant 0 : i32
    %c0_i32_1 = arith.constant 0 : i32
    return %c0_i32, %c0_i32_0 : i32, i32
  }
  func.func @transform_2(%arg0: i32) -> (i32, i32) {
    %c0_i32 = arith.constant 0 : i32
    %c0_i32_0 = arith.constant 0 : i32
    %c0_i32_1 = arith.constant 0 : i32
    return %c0_i32, %c0_i32_0 : i32, i32
  }
  func.func @transform_3(%arg0: i32) -> (i32, i32) {
    %c0_i32 = arith.constant 0 : i32
    %c0_i32_0 = arith.constant 0 : i32
    %c0_i32_1 = arith.constant 0 : i32
    return %c0_i32, %c0_i32_0 : i32, i32
  }
  func.func @transform_4(%arg0: i32) -> (i32, i32) {
    %c0_i32 = arith.constant 0 : i32
    %c0_i32_0 = arith.constant 0 : i32
    %c0_i32_1 = arith.constant 0 : i32
    return %c0_i32, %c0_i32_0 : i32, i32
  }
  func.func @transform_5(%arg0: i32) -> (i32, i32) {
    %c0_i32 = arith.constant 0 : i32
    %c0_i32_0 = arith.constant 0 : i32
    %c0_i32_1 = arith.constant 0 : i32
    return %c0_i32, %c0_i32_0 : i32, i32
  }
  func.func @transform_6(%arg0: i32) -> (i32, i32, i32, i32) {
    %c0_i32 = arith.constant 0 : i32
    %c0_i32_0 = arith.constant 0 : i32
    %c0_i32_1 = arith.constant 0 : i32
    %c0_i32_2 = arith.constant 0 : i32
    return %c0_i32, %arg0, %c0_i32_0, %c0_i32_1 : i32, i32, i32, i32
  }
}

</mosaic_0001>

<bundles_post_ra>
// kernel: tpu_custom_call.1
= control target key start
LH: loop header
LB: loop body
LE: loop exit
PB: predicated region body
PF: predicated region fallthrough
CT: control target
= control target key end

     0   :  { %11 = vsyncpa [#allocation4], 0  ;;  %s2303_s0 = inlined_call_operand.vmem [shape: f32[2,2,4,256], index: 0, kind: input, shape index: {}]   ;;  %s2304_s1 = inlined_call_operand.vmem [shape: f32[8,4], index: 1, kind: input, shape index: {}]   ;;  %s2305_s2 = inlined_call_operand.vmem [shape: f32[8,1], index: 2, kind: input, shape index: {}]   ;;  %s2306_s3 = inlined_call_operand.vmem [shape: f32[8,4], index: 3, kind: input, shape index: {}]   ;;  %s2307_s4 = inlined_call_operand.vmem [shape: f32[4,8], index: 4, kind: input, shape index: {}]   ;;  %s2308_s5 = inlined_call_operand.vmem [shape: f32[4,1], index: 5, kind: input, shape index: {}]   ;;  %s2309_s6 = inlined_call_operand.hbm [shape: f32[2,2,4,256], index: 6, kind: output, shape index: {}]  }
   0x1   :  { %13 = vsyncpa [#allocation4 + $0x1], 0  ;;  %s2111_s21 = smov 0   ;;  %s2113_s22 = smov 0  }
   0x2   :  { %s2115_s23 = smov 0   ;;  %s2117_s24 = smov 0  }
   0x3 LB: > { %s1849_s25 = sadd.s32 4294967295, %s2067_s24   ;;  %s1850_s26 = sadd.s32 4294967294, %s2067_s24   ;;  %s2067_s24 = sphi %s2117_s24, %s2315_s24   ;;  %s2063_s23 = sphi %s2115_s23, %s2314_s23   ;;  %s2059_s22 = sphi %s2113_s22, %s2313_s22   ;;  %s2055_s21 = sphi %s2111_s21, %s2312_s21  }
   0x4   : > { %s2134_s27 = sadd.s32 1, %s2067_s24   ;;  %s26_s28 = sadd.s32 1, %s2063_s23 }
   0x5   : > { %s23_s29 = ssub.s32 %s2067_s24, %s2134_s27  ;;  %p33_p0 = scmp.ne.s32.totalorder %s2063_s23, %s2059_s22 }
   0x6   : > { %p24_p1 = scmp.eq.s32.totalorder %s23_s29, 0  ;;  %p34_p2 = scmp.eq.s32.totalorder %s2067_s24, 0 }
   0x7   : > { %p168_p3 = scmp.eq.s32.totalorder %s1849_s25, 1  ;;  %p173_p4 = scmp.ne.s32.totalorder %s2059_s22, %s2055_s21 }
   0x8   : > { %s2147_s30 = scalar_select %p24_p1, %s2063_s23, %s26_s28  }
   0x9   : > { %p35_p5 = por %p34_p2, %p33_p0  ;;  %p2149_p6 = por %p168_p3, %p33_p0 }
   0xa   : > { %p174_p7 = scmp.eq.s32.totalorder %s1850_s26, 1  ;;  %p1852_p9 = scmp.ge.s32.totalorder %s2067_s24, 2 }
   0xc   : > { %p2153_p8 = por %p174_p7, %p173_p4  ;;  %205 = sbr.rel (%p1852_p9) target bundleno = 26 (0x1a), region = 36 }
  0x13   : > { %208 = sbr.rel (!%p35_p5) target bundleno = 26 (0x1a), region = 40  ;;  %s210_s9 = sand.u32 (%p35_p5), 1, %s2063_s23  }
  0x14   : > { %s1866_s10 = sshll.u32 (%p35_p5), %s2067_s24, 3  ;;  %s1853_s11 = sshll.u32 (%p35_p5), %s210_s9, 4 }
  0x15   : > { %s215_s14 = scalar_lea.vmem (%p35_p5), %s2303_s0, %s1866_s10  ;;  %s212_s15 = scalar_lea.vmem (%p35_p5), [#allocation2], %s1853_s11 }
  0x16   : > { %v245_v0 = vld [vmem:[%s215_s14] sm:$0xff] (%p35_p5)  ;;  %v247_v1 = vld [vmem:[%s215_s14 + $0x10] sm:$0xff] (%p35_p5) }
  0x17   : > { %246 = vst [vmem:[%s212_s15] sm:$0xff] (%p35_p5), %v245_v0  ;;  %248 = vst [vmem:[%s212_s15 + $0x8] sm:$0xff] (%p35_p5), %v247_v1 }
  0x1a PF: > { %p1856_p10 = scmp.ge.s32.totalorder %s2067_s24, 1  ;;  %p253_p11 = scmp.lt.s32.totalorder %s2067_s24, 3 }
  0x1c   : > { %p254_p12 = pnand %p1856_p10, %p253_p11 }
  0x1d   : > { %s260_s16 = sand.u32 (!%p254_p12), 1, %s2059_s22   ;;  %vm306_vm0 = vcmask (!%p254_p12), 1043456   ;;  %v2069_v12 = vmov (!%p254_p12), 0.0   ;;  %vm2070_vm1 = vmmov (!%p254_p12), 0   ;;  %v334_v21 = vld [vmem:[%s2304_s1] sm:$0xff] (!%p254_p12)  ;;  %vm336_vm2 = vcmask (!%p254_p12), 31744  }
  0x1e   : > { %257 = sbr.rel (%p254_p12) target bundleno = 882 (0x372), region = 78  ;;  %s2170_s17 = sshll.u32 (!%p254_p12), %s260_s16, 4  ;;  %1880 = vmatprep.subr.mxu1 (!%p254_p12), %v2069_v12  ;;  %1895 = vmatprep.subr.mxu0 (!%p254_p12), %v2069_v12  ;;  %v338_v25 = vsel (!%p254_p12), %vm336_vm2, %v334_v21, 0  ;;  %v789_v41 = vld [vmem:[%s2306_s3] sm:$0xff] (!%p254_p12)  ;;  %vm1278_vm7 = vcmask (!%p254_p12), 64512  }
  0x1f   : > { %s262_s18 = scalar_lea.vmem (!%p254_p12), [#allocation2], %s2170_s17  ;;  %1882 = vmatprep.mubr.msk.f32.mxu1 (!%p254_p12), %vm2070_vm1, %v2069_v12  ;;  %1897 = vmatprep.mubr.msk.f32.mxu0 (!%p254_p12), %vm2070_vm1, %v2069_v12  ;;  %v2201_v28 = vand.u32 (!%p254_p12), 4294901760, %v338_v25  ;;  %v798_v47 = vsel (!%p254_p12), %vm336_vm2, %v789_v41, 0  ;;  %s288_s14 = scalar_lea.vmem (!%p254_p12), [#allocation3], %s2170_s17 }
  0x20   : > { %v2173_v2 = vld [vmem:[%s262_s18] sm:$0xff] (!%p254_p12)  ;;  %v2175_v3 = vld [vmem:[%s262_s18 + $0x8] sm:$0xff] (!%p254_p12)  ;;  %v871_v51 = vand.u32 (!%p254_p12), 4294901760, %v798_v47  ;;  %s1782_s15 = sshll.u32 (!%p254_p12), %s288_s14, 4  ;;  %s1867_s18 = sshll.u32 (!%p254_p12), %s1849_s25, 7  ;;  %s2250_s15 = int_to_ptr.vmem [resolvable:$true] %s1782_s15 }
  0x21   : > { %v304_v4 = vcombine.high (!%p254_p12), %v2173_v2, %v2173_v2  ;;  %v307_v5 = vsel (!%p254_p12), %vm306_vm0, %v2173_v2, 0.0  ;;  %v315_v6 = vcombine.high (!%p254_p12), %v2175_v3, %v2175_v3  ;;  %v317_v8 = vsel (!%p254_p12), %vm306_vm0, %v2175_v3, 0.0  ;;  %s2255_s26 = scalar_lea.hbm (!%p254_p12), %s2309_s6, %s1867_s18  ;;  %s2261_s25 = scalar_lea.sflag (!%p254_p12), [#allocation4], %s260_s16 }
  0x22   : > { %v292_v13 = vmul.f32 (!%p254_p12), %v2173_v2, %v2173_v2  ;;  %v293_v14 = vmul.f32 (!%p254_p12), %v2175_v3, %v2175_v3  ;;  %v410_v30 = vsub.f32 (!%p254_p12), %v338_v25, %v2201_v28  ;;  %v872_v56 = vsub.f32 (!%p254_p12), %v798_v47, %v871_v51  ;;  %s2005_s17 = scalar_lea.vmem (!%p254_p12), %s2250_s15, 256  ;;  %s2072_s28 = smov (!%p254_p12), [#allocation3]  }
  0x23   : > { %v308_v7 = vsel (!%p254_p12), %vm306_vm0, %v304_v4, 0.0  ;;  %v318_v10 = vsel (!%p254_p12), %vm306_vm0, %v315_v6, 0.0  ;;  %v2071_v6 = vmov (!%p254_p12), 0   ;;  %p2006_p13 = scmp.ne.s32.totalorder (!%p254_p12), %s2250_s15, %s2005_s17  ;;  %s2009_s29 = sshll.u32 (!%p254_p12), %s2072_s28, 4  ;;  %s2010_s29 = int_to_ptr.vmem [resolvable:$false] %s2009_s29 }
  0x24   : > { %v309_v9 = vadd.f32 (!%p254_p12), %v308_v7, %v307_v5  ;;  %v319_v11 = vadd.f32 (!%p254_p12), %v318_v10, %v317_v8  ;;  %v294_v15 = vadd.f32 (!%p254_p12), %v293_v14, %v292_v13  ;;  %v411_v33 = vand.u32 (!%p254_p12), 4294901760, %v410_v30  ;;  %1989 = vset.pattern.permute.xlu1 (!%p254_p12), %v2071_v6  ;;  %1990 = vset.pattern.permute.xlu0 (!%p254_p12), %v2071_v6  ;;  %v335_v7 = vld [vmem:[%s2305_s2] sm:$0xff] (!%p254_p12)  ;;  %s2011_s9 = scalar_lea.vmem (!%p254_p12), %s2010_s29, 512  ;;  %p2012_p2 = scmp.lt.s32.totalorder (!%p254_p12), %s2250_s15, %s2010_s29 }
  0x25   : > { %v873_v60 = vand.u32 4294901760, %v872_v56  ;;  %p2007_p0 = pnand %p2006_p13, %p2149_p6  ;;  %p2013_p3 = scmp.lt.s32.totalorder %s2011_s9, %s2005_s17 }
  0x26   : > { %310 = vadd.xlane.f32.xlu0 %v309_v9  ;;  %v295_v16 = vadd.f32 1e-08, %v294_v15  ;;  %v412_v38 = vsub.f32 %v410_v30, %v411_v33  ;;  %v1272_v15 = vld [vmem:[%s2308_s5] sm:$0xf] }
  0x27   : > { %v874_v63 = vsub.f32 %v872_v56, %v873_v60  ;;  %p2008_p1 = pneg %p2007_p0  ;;  %p2014_p4 = por %p2013_p3, %p2012_p2 }
  0x28   : > { %1993 = vrsqrt.f32 %v295_v16  ;;  %vm298_vm3 = vcmp.eq.f32.partialorder %v295_v16, inf  ;;  %v301_v31 = vand.u32 2147483648, %v295_v16  ;;  %vm300_vm4 = vcmp.eq.f32.partialorder %v295_v16, 0.0 }
  0x29   : > { %v413_v45 = vand.u32 4294901760, %v412_v38  ;;  %v875_v4 = vand.u32 4294901760, %v874_v63  ;;  %p2015_p5 = pnand %p2014_p4, %p2008_p1 }
  0x2a   : > { %320 = vadd.xlane.f32.xlu0 %v319_v11 }
  0x32   : > { %v1994_v26 = vpop.eup %1993 }
  0x33   : > { %v297_v29 = vmul.f32 %v1994_v26, %v295_v16 }
  0x35   : > { %v299_v32 = vsel %vm298_vm3, %v295_v16, %v297_v29 }
  0x36   : > { %v302_v34 = vsel %vm300_vm4, %v301_v31, %v299_v32 }
  0x37   : > { %v796_v36 = vcombine.high %v302_v34, %v302_v34  ;;  %v800_v49 = vsel %vm306_vm0, %v302_v34, 0 }
  0x38   : > { %v806_v53 = vand.u32 4294901760, %v800_v49 }
  0x39   : > { %v802_v43 = vsel %vm306_vm0, %v796_v36, 0 }
  0x3a   : > { %v804_v48 = vand.u32 4294901760, %v802_v43  ;;  %v889_v58 = vsub.f32 %v800_v49, %v806_v53 }
  0x3c   : > { %v883_v54 = vsub.f32 %v802_v43, %v804_v48  ;;  %v890_v61 = vand.u32 4294901760, %v889_v58 }
  0x3e   : > { %v884_v59 = vand.u32 4294901760, %v883_v54  ;;  %v891_v0 = vsub.f32 %v889_v58, %v890_v61 }
  0x40   : > { %v885_v62 = vsub.f32 %v883_v54, %v884_v59  ;;  %v892_v5 = vand.u32 4294901760, %v891_v0 }
  0x42   : > { %v886_v1 = vand.u32 4294901760, %v885_v62 }
  0xb3   : > { %v311_v17 = vpop.xlane.xlu0 %310 }
  0xb4   : > { %v313_v18 = vmul.f32 0.00390625, %v311_v17 }
  0xb6   : > { %v323_v22 = vmul.f32 %v313_v18, %v313_v18  ;;  %v1271_v18 = vld [vmem:[%s2307_s4] sm:$0xf] }
  0xb7   : > { %v321_v19 = vpop.xlane.xlu0 %320 }
  0xb8   : > { %v322_v20 = vmul.f32 0.00390625, %v321_v19  ;;  %v1280_v19 = vsel %vm1278_vm7, %v1271_v18, 0 }
  0xba   : > { %v324_v23 = vmul.f32 %v322_v20, %v322_v20  ;;  %v1349_v20 = vand.u32 4294901760, %v1280_v19 }
  0xbc   : > { %v325_v24 = vadd.f32 %v324_v23, %v323_v22  ;;  %v1350_v21 = vsub.f32 %v1280_v19, %v1349_v20 }
  0xbe   : > { %v326_v27 = vadd.f32 1e-08, %v325_v24  ;;  %v1351_v22 = vand.u32 4294901760, %v1350_v21 }
  0xc0   : > { %1995 = vrsqrt.f32 %v326_v27  ;;  %vm329_vm5 = vcmp.eq.f32.partialorder %v326_v27, inf  ;;  %v332_v39 = vand.u32 2147483648, %v326_v27  ;;  %vm331_vm6 = vcmp.eq.f32.partialorder %v326_v27, 0.0 }
  0xc1   : > { %v1352_v26 = vsub.f32 %v1350_v21, %v1351_v22 }
  0xc3   : > { %v1353_v31 = vand.u32 4294901760, %v1352_v26 }
  0xca   : > { %v1996_v35 = vpop.eup %1995 }
  0xcb   : > { %v328_v37 = vmul.f32 %v1996_v35, %v326_v27 }
  0xcd   : > { %v330_v40 = vsel %vm329_vm5, %v326_v27, %v328_v37 }
  0xce   : > { %v333_v42 = vsel %vm331_vm6, %v332_v39, %v330_v40 }
  0xcf   : > { %v341_v44 = vsel %vm306_vm0, %v333_v42, 0 }
  0xd0   : > { %v344_v46 = vand.u32 4294901760, %v341_v44 }
  0xd2   : > { %1881 = vmatpush3.msra.mxu1 %v344_v46  ;;  %v421_v50 = vsub.f32 %v341_v44, %v344_v46  ;;  %1896 = vmatpush3.msra.mxu0 %v344_v46 }
  0xd3   : > { %1883 = vmatmul.mubr.f32.vlgmr.msra.gmra.mrb[0].mxu1 %v413_v45  ;;  %1898 = vmatmul.mubr.f32.vlgmr.msra.gmra.mrb[0].mxu0 %v411_v33 }
  0xd4   : > { %1900 = vmatprep.subr.mxu0 %v2069_v12  ;;  %v422_v52 = vand.u32 4294901760, %v421_v50  ;;  %1885 = vmatprep.subr.mxu1 %v2069_v12 }
  0xd5   : > { %1887 = vmatprep.mubr.msk.f32.mxu1 %vm2070_vm1, %v2069_v12  ;;  %1902 = vmatprep.mubr.msk.f32.mxu0 %vm2070_vm1, %v2069_v12 }
  0xd6   : > { %1901 = vmatpush3.msra.mxu0 %v422_v52  ;;  %v423_v55 = vsub.f32 %v421_v50, %v422_v52 }
  0xd7   : > { %1905 = vmatprep.subr.mxu0 %v2069_v12 }
  0xd8   : > { %v424_v57 = vand.u32 4294901760, %v423_v55 }
  0xda   : > { %1886 = vmatpush3.msra.mxu1 %v424_v57 }
  0xdb   : > { %1888 = vmatmul.mubr.f32.vlgmr.msra.gmra.mrb[0].mxu1 %v2201_v28  ;;  %1890 = vmatprep.subr.mxu1 %v2069_v12 }
  0xdc   : > { %1903 = vmatmul.mubr.f32.vlgmr.msra.gmra.mrb[0].mxu0 %v2201_v28  ;;  %1891 = vmatpush3.msra.mxu1 %v421_v50 }
  0xdd   : > { %1906 = vmatpush3.msra.mxu0 %v344_v46  ;;  %1892 = vmatprep.mubr.msk.f32.mxu1 %vm2070_vm1, %v2069_v12 }
  0xde   : > { %1907 = vmatprep.mubr.msk.f32.mxu0 %vm2070_vm1, %v2069_v12  ;;  %805 = vmatprep.subr.mxu1 %v804_v48 }
  0xe3   : > { %1893 = vmatmul.mubr.f32.vlgmr.msra.gmra.mrb[0].mxu1 %v410_v30 }
  0xe4   : > { %1908 = vmatmul.mubr.f32.vlgmr.msra.gmra.mrb[0].mxu0 %v2201_v28  ;;  %807 = vmatpush1.msra.mxu1 %v806_v53 }
  0xe5   : > { %870 = vmatprep.mubr.f32.mxu1 %v2069_v12  ;;  %887 = vmatprep.subr.mxu1 %v886_v1 }
  0xe6   : > { %1348 = vmatprep.mubr.f32.mxu0 %v2069_v12 }
  0xe7   : > { %876 = vmatmul.mubr.f32.vlgmr.msra.gmra.mrb[2].mxu1 %v875_v4 }
  0xe8   : > { %893 = vmatpush1.msra.mxu1 %v892_v5  ;;  %956 = vmatprep.mubr.f32.mxu1 %v2069_v12 }
  0xe9   : > { %966 = vmatprep.subr.mxu1 %v883_v54 }
  0xef   : > { %958 = vmatmul.mubr.f32.vlgmr.msra.gmra.mrb[2].mxu1 %v871_v51 }
  0xf0   : > { %969 = vmatpush1.msra.mxu1 %v889_v58  ;;  %1032 = vmatprep.mubr.f32.mxu1 %v2069_v12 }
  0xf1   : > { %1042 = vmatprep.subr.mxu1 %v804_v48 }
  0xf7   : > { %1035 = vmatmul.mubr.f32.vlgmr.msra.gmra.mrb[2].mxu1 %v872_v56 }
  0xf8   : > { %1044 = vmatpush1.msra.mxu1 %v806_v53  ;;  %1107 = vmatprep.mubr.f32.mxu1 %v2069_v12 }
  0xf9   : > { %1120 = vmatprep.subr.mxu1 %v884_v59 }
  0xff   : > { %1111 = vmatmul.mubr.f32.vlgmr.msra.gmra.mrb[2].mxu1 %v873_v60 }
 0x100   : > { %1124 = vmatpush1.msra.mxu1 %v890_v61  ;;  %1187 = vmatprep.mubr.f32.mxu1 %v2069_v12 }
 0x101   : > { %1196 = vmatprep.subr.mxu1 %v804_v48 }
 0x107   : > { %1189 = vmatmul.mubr.f32.vlgmr.msra.gmra.mrb[2].mxu1 %v871_v51 }
 0x108   : > { %1198 = vmatpush1.msra.mxu1 %v806_v53  ;;  %1261 = vmatprep.mubr.f32.mxu1 %v2069_v12 }
 0x10f   : > { %1263 = vmatmul.mubr.f32.vlgmr.msra.gmra.mrb[2].mxu1 %v871_v51 }
 0x1b6   : > { %v565_v8 = vpop.f32.mrb[0].mxu1 }
 0x1b7   : > { %v1910_v9 = vadd.f32 %v565_v8, %v335_v7  ;;  %v785_v10 = vpop.f32.mrb[0].mxu0  ;;  %v1894_v11 = vpop.f32.mrb[1].mxu1 }
 0x1b8   : > { %v1909_v13 = vpop.f32.mrb[1].mxu0 }
 0x1b9   : > { %v1911_v14 = vadd.f32 %v1910_v9, %v785_v10 }
 0x1bb   : > { %792 = vperm.xlu1 %1989, %v1911_v14  }
 0x1bf   : > { %1275 = vperm.xlu1 %1989, %v1272_v15  }
 0x1e2   : > { %v1264_v16 = vpop.f32.mrb[2].mxu1 }
 0x1e3   : > { %v1266_v17 = vpop.f32.mrb[3].mxu1 }
 0x23a   : > { %v793_v23 = vpop.permute.xlu1 %792 }
 0x23b   : > { %v1912_v24 = vadd.f32 %v1264_v16, %v793_v23  ;;  %v1913_v25 = vadd.f32 %v1266_v17, %v793_v23 }
 0x23d   : > { %v1269_v27 = vmax.f32 %v1912_v24, 0.0  ;;  %v1270_v28 = vmax.f32 %v1913_v25, 0.0 }
 0x23e   : > { %v1276_v40 = vpop.permute.xlu1 %1275 }
 0x23f   : > { %v1282_v29 = vand.u32 4294901760, %v1270_v28  ;;  %v1284_v30 = vand.u32 4294901760, %v1269_v27 }
 0x241   : > { %v1361_v32 = vsub.f32 %v1270_v28, %v1282_v29  ;;  %v1367_v33 = vsub.f32 %v1269_v27, %v1284_v30  ;;  %1283 = vmatprep.subr.mxu0 %v1282_v29 }
 0x242   : > { %1285 = vmatpush1.msra.mxu0 %v1284_v30 }
 0x243   : > { %v1368_v34 = vand.u32 4294901760, %v1367_v33  ;;  %1354 = vmatmul.mubr.f32.vlgmr.msra.gmra.mrb[2].mxu0 %v1353_v31  ;;  %v1362_v35 = vand.u32 4294901760, %v1361_v32 }
 0x244   : > { %1434 = vmatprep.mubr.f32.mxu0 %v2069_v12 }
 0x245   : > { %v1363_v36 = vsub.f32 %v1361_v32, %v1362_v35  ;;  %v1369_v37 = vsub.f32 %v1367_v33, %v1368_v34 }
 0x247   : > { %v1364_v38 = vand.u32 4294901760, %v1363_v36  ;;  %v1370_v39 = vand.u32 4294901760, %v1369_v37 }
 0x249   : > { %1365 = vmatprep.subr.mxu0 %v1364_v38 }
 0x24a   : > { %1371 = vmatpush1.msra.mxu0 %v1370_v39 }
 0x24b   : > { %1436 = vmatmul.mubr.f32.vlgmr.msra.gmra.mrb[2].mxu0 %v1349_v20  ;;  %1444 = vmatprep.subr.mxu0 %v1361_v32 }
 0x24c   : > { %1447 = vmatpush1.msra.mxu0 %v1367_v33  ;;  %1510 = vmatprep.mubr.f32.mxu0 %v2069_v12 }
 0x24d   : > { %1520 = vmatprep.subr.mxu0 %v1282_v29 }
 0x253   : > { %1513 = vmatmul.mubr.f32.vlgmr.msra.gmra.mrb[2].mxu0 %v1350_v21 }
 0x254   : > { %1522 = vmatpush1.msra.mxu0 %v1284_v30  ;;  %1585 = vmatprep.mubr.f32.mxu0 %v2069_v12 }
 0x255   : > { %1598 = vmatprep.subr.mxu0 %v1362_v35 }
 0x25b   : > { %1589 = vmatmul.mubr.f32.vlgmr.msra.gmra.mrb[2].mxu0 %v1351_v22 }
 0x25c   : > { %1602 = vmatpush1.msra.mxu0 %v1368_v34  ;;  %1665 = vmatprep.mubr.f32.mxu0 %v2069_v12 }
 0x25d   : > { %1674 = vmatprep.subr.mxu0 %v1282_v29 }
 0x263   : > { %1667 = vmatmul.mubr.f32.vlgmr.msra.gmra.mrb[2].mxu0 %v1349_v20 }
 0x264   : > { %1676 = vmatpush1.msra.mxu0 %v1284_v30  ;;  %1739 = vmatprep.mubr.f32.mxu0 %v2069_v12 }
 0x26b   : > { %1741 = vmatmul.mubr.f32.vlgmr.msra.gmra.mrb[2].mxu0 %v1349_v20 }
 0x33e   : > { %v1742_v41 = vpop.f32.mrb[2].mxu0 }
 0x33f   : > { %v1914_v42 = vadd.f32 %v1742_v41, %v1276_v40  ;;  %v1744_v43 = vpop.f32.mrb[3].mxu0 }
 0x340   : > { %v1915_v44 = vadd.f32 %v1744_v43, %v1276_v40 }
 0x341   : > { %v1747_v45 = vsub.f32 0.0, %v1914_v42 }
 0x342   : > { %v1748_v46 = vsub.f32 0.0, %v1915_v44 }
 0x343   : > { %v1749_v47 = vmul.f32 1.442695, %v1747_v45 }
 0x344   : > { %v1751_v48 = vmul.f32 1.442695, %v1748_v46 }
 0x345   : > { %1997 = vpow2.f32 %v1749_v47 }
 0x346   : > { %1999 = vpow2.f32 %v1751_v48 }
 0x34f   : > { %v1998_v49 = vpop.eup %1997 }
 0x350   : > { %v2000_v50 = vpop.eup %1999  ;;  %v1753_v51 = vadd.f32 1.0, %v1998_v49 }
 0x351   : > { %v1754_v52 = vadd.f32 1.0, %v2000_v50 }
 0x352   : > { %2001 = vrcp.f32 %v1753_v51 }
 0x353   : > { %2003 = vrcp.f32 %v1754_v52 }
 0x35c   : > { %v2002_v12 = vpop.eup %2001 }
 0x35d   : > { %v2004_v53 = vpop.eup %2003 }
 0x35e   : > { %v1761_v54 = vcombine.low %v2002_v12, %v2004_v53 }
 0x360   : > { %v1763_v55 = vmul.f32 %v1761_v54, %v2173_v2  ;;  %v1765_v56 = vmul.f32 %v2175_v3, %v1761_v54 }
 0x362   : > { %1764 = vst [vmem:[%s288_s14] sm:$0xff] %v1763_v55  ;;  %1860 = vst [vmem:[%s288_s14 + $0x8] sm:$0xff] %v1765_v56 }
 0x363   : > { %2018 = shalt.err (!%p2015_p5)
}
 0x364   : > { %s2019_s16 = scalar_lea.hbm %s2255_s26, 256  ;;  %s2023_s12 = scalar_lea.hbm %s2309_s6, 512 }
 0x365   : > { %p2020_p7 = scmp.ne.s32.totalorder %s2255_s26, %s2019_s16  ;;  %p2024_p12 = scmp.lt.u32.totalorder %s2255_s26, %s2309_s6 }
 0x366   : > { %p2025_p13 = scmp.lt.u32.totalorder %s2023_s12, %s2019_s16  ;;  %p2027_p1 = scmp.lt.u32.totalorder %s2019_s16, %s2255_s26 }
 0x367   : > { %p2021_p10 = pnand %p2020_p7, %p2149_p6 }
 0x368   : > { %p2026_p0 = por %p2025_p13, %p2024_p12 }
 0x369   : > { %p2022_p11 = pneg %p2021_p10 }
 0x36a   : > { %p2028_p2 = por %p2027_p1, %p2026_p0 }
 0x36c   : > { %p2029_p3 = pnand %p2028_p2, %p2022_p11 }
 0x36e   : > { %2032 = shalt.err (!%p2029_p3)
}
 0x36f   : > { %s2073_s18 = smov 128   ;;  %s2074_s19 = smov 256  }
 0x370   : > { %s2075_s20 = smov 8  }
 0x371   : > { %1944 = dma.vmem_to_hbm [thread:$0]  (%p2149_p6), %s2250_s15, 256, %s2255_s26, %s2261_s25, %s2073_s18, %s2074_s19, %s2075_s20  }
 0x372 PF: > { %s1797_s17 = sand.u32 1, %s2055_s21   ;;  %p1947_p4 = pnand %p1852_p9, %p2153_p8 }
 0x373   : > { %s1798_s28 = scalar_lea.sflag [#allocation4], %s1797_s17 }
 0x374   : > { %2050 = dma.done.wait (!%p1947_p4), %s1798_s28, 256  }
 0x375   : > { %2052 = vsyncadd (!%p1947_p4), %s1798_s28, 4294967040  ;;  %p16_p5 = scmp.ge.s32.totalorder %s2134_s27, 4   ;;  %s2312_s21 = smov %s2059_s22 }
 0x376   : > { %s2313_s22 = smov %s2063_s23  ;;  %s2314_s23 = smov %s2147_s30 }
 0x377   : > { %s2315_s24 = smov %s2134_s27  ;;  %18 = sbr.rel (!%p16_p5) target bundleno = 3 (0x3), region = 124 }
 0x37e   :  { %1803 = vsyncpa [#allocation4], 1 }
 0x37f   :  { %1805 = vsyncpa [#allocation4 + $0x1], 1 }

</bundles_post_ra>
